<compile_context>
chip_gen: v5e
topology: v5e:2x2
jax: 0.10.0
libtpu: 0.0.40
codegen_flags: <defaults>
</compile_context>

<pallas_src>
import numpy as np
import jax
import jax.numpy as jnp
from jax import lax
from jax.experimental import pallas as pl
from jax.experimental.pallas import tpu as pltpu

THRESHOLD = 0.01          # BaseModel.threshold
DUMMY_PICK_VAL = -1.0     # DUMMY_PICK = -np.ones(2)
OUT_LANES = 128           # lane-dense packed slab width
GATHER_WINDOW = 128       # lane-aligned window DMA'd around each argmax column


# --------------------------------------------------------------------------
# Kernel 1: running (max, first-index) reduction over N for both arms.
# Grid: (N // tn,) "arbitrary"; heatmaps streamed as (B, tn) VMEM tiles.
# --------------------------------------------------------------------------
def _reduce_kernel(l_ref, r_ref, conf_out, idx_out, lm, rm, li, ri):
    k = pl.program_id(0)
    tn = l_ref.shape[1]

    @pl.when(k == 0)
    def _init():
        lm[...] = jnp.full_like(lm, -jnp.inf)
        rm[...] = jnp.full_like(rm, -jnp.inf)
        li[...] = jnp.zeros_like(li)
        ri[...] = jnp.zeros_like(ri)

    lhm = l_ref[...]                                      # (B, tn) f32
    rhm = r_ref[...]
    col = lax.broadcasted_iota(jnp.int32, lhm.shape, 1)   # (B, tn)

    # Tile max + first-occurrence index within the tile (torch.argmax semantics).
    l_tmax = jnp.max(lhm, axis=1, keepdims=True)          # (B, 1)
    r_tmax = jnp.max(rhm, axis=1, keepdims=True)
    l_tidx = jnp.min(jnp.where(lhm == l_tmax, col, tn), axis=1, keepdims=True)
    r_tidx = jnp.min(jnp.where(rhm == r_tmax, col, tn), axis=1, keepdims=True)

    # Strict '>' keeps the earliest global index on cross-tile ties.
    l_better = l_tmax > lm[...]
    r_better = r_tmax > rm[...]
    lm[...] = jnp.where(l_better, l_tmax, lm[...])
    rm[...] = jnp.where(r_better, r_tmax, rm[...])
    li[...] = jnp.where(l_better, k * tn + l_tidx, li[...])
    ri[...] = jnp.where(r_better, k * tn + r_tidx, ri[...])

    @pl.when(k == pl.num_programs(0) - 1)
    def _finalize():
        B = lm.shape[0]
        padf = jnp.zeros((B, OUT_LANES - 2), dtype=conf_out.dtype)
        padi = jnp.zeros((B, OUT_LANES - 2), dtype=idx_out.dtype)
        conf_out[...] = jnp.concatenate([lm[...], rm[...], padf], axis=1)
        idx_out[...] = jnp.concatenate([li[...], ri[...], padi], axis=1)


# --------------------------------------------------------------------------
# Kernel 2: targeted DMA gather of the winning pc columns + masking + packing.
# pc stays in HBM (pl.ANY); only 2*B windows of (C, 128) are read.
# --------------------------------------------------------------------------
def _gather_kernel(idx_sm, conf_ref, idx_ref, pc_hbm, out_ref, buf, sem):
    n_arms, B, C, GW = buf.shape

    # Issue one small strided DMA per (arm, batch): the 128-lane window that
    # contains the argmax column.
    copies = []
    for a in range(n_arms):
        for b in range(B):
            win = idx_sm[b, a] // GW                      # scalar read from SMEM
            start = pl.multiple_of(win * GW, GW)
            cp = pltpu.make_async_copy(
                pc_hbm.at[b, :, pl.ds(start, GW)],        # (C, GW) in HBM
                buf.at[a, b],                             # (C, GW) in VMEM
                sem.at[a, b])
            cp.start()
            copies.append(cp)
    for cp in copies:
        cp.wait()

    l_conf = conf_ref[:, 0:1]                             # (B, 1)
    r_conf = conf_ref[:, 1:2]
    l_off = idx_ref[:, 0:1] & (GW - 1)                    # offset inside window
    r_off = idx_ref[:, 1:2] & (GW - 1)

    lane = lax.broadcasted_iota(jnp.int32, (B, 1, GW), 2)
    l_one = (lane == l_off[:, :, None]).astype(buf.dtype) # (B, 1, GW)
    r_one = (lane == r_off[:, :, None]).astype(buf.dtype)
    l_raw = jnp.sum(buf[0] * l_one, axis=-1)              # (B, C)
    r_raw = jnp.sum(buf[1] * r_one, axis=-1)

    # mask = conf >= threshold OR this arm is the argmax arm (ties -> left).
    l_keep = jnp.logical_or(l_conf >= THRESHOLD, l_conf >= r_conf)
    r_keep = jnp.logical_or(r_conf >= THRESHOLD, r_conf > l_conf)
    l_pick = jnp.where(l_keep, l_raw, DUMMY_PICK_VAL)
    r_pick = jnp.where(r_keep, r_raw, DUMMY_PICK_VAL)

    pad = jnp.zeros((B, OUT_LANES - (2 * C + 2)), dtype=out_ref.dtype)
    out_ref[...] = jnp.concatenate([l_pick, r_pick, l_conf, r_conf, pad], axis=1)


def get_action_bimanual(left_pick_heatmap, right_pick_heatmap, pixel_sampled_pc,
                        *, n_tile=512):
    """Pallas-fused equivalent of BaseModel.get_action (bimanual, requires_graph)."""
    B, N = left_pick_heatmap.shape
    C = pixel_sampled_pc.shape[1]
    assert 2 * C + 2 <= OUT_LANES, "packed output slab too narrow"

    tn = min(n_tile, N)
    assert N % GATHER_WINDOW == 0 and tn % GATHER_WINDOW == 0 and N % tn == 0, (
        "N must be a multiple of 128 (pad upstream)")
    num_tiles = N // tn

    # Stage 1: per-arm running argmax / max over N (heatmaps only touch HBM once).
    conf_slab, idx_slab = pl.pallas_call(
        _reduce_kernel,
        out_shape=(jax.ShapeDtypeStruct((B, OUT_LANES), jnp.float32),
                   jax.ShapeDtypeStruct((B, OUT_LANES), jnp.int32)),
        grid=(num_tiles,),
        in_specs=[pl.BlockSpec((B, tn), lambda k: (0, k)),
                  pl.BlockSpec((B, tn), lambda k: (0, k))],
        out_specs=(pl.BlockSpec((B, OUT_LANES), lambda k: (0, 0)),
                   pl.BlockSpec((B, OUT_LANES), lambda k: (0, 0))),
        scratch_shapes=[pltpu.VMEM((B, 1), jnp.float32),
                        pltpu.VMEM((B, 1), jnp.float32),
                        pltpu.VMEM((B, 1), jnp.int32),
                        pltpu.VMEM((B, 1), jnp.int32)],
        compiler_params=pltpu.CompilerParams(
            dimension_semantics=("arbitrary",),
            vmem_limit_bytes=32 * 1024 * 1024),
    )(left_pick_heatmap, right_pick_heatmap)

    # Stage 2: targeted gather of pc columns (pc stays in HBM) + masking + packing.
    packed = pl.pallas_call(
        _gather_kernel,
        out_shape=jax.ShapeDtypeStruct((B, OUT_LANES), jnp.float32),
        in_specs=[
            pl.BlockSpec(memory_space=pltpu.MemorySpace.SMEM),  # idx (scalar DMA addressing)
            pl.BlockSpec(memory_space=pltpu.MemorySpace.VMEM),  # conf slab
            pl.BlockSpec(memory_space=pltpu.MemorySpace.VMEM),  # idx slab (vector one-hot)
            pl.BlockSpec(memory_space=pl.ANY),                  # pc left in HBM
        ],
        out_specs=pl.BlockSpec(memory_space=pltpu.MemorySpace.VMEM),
        scratch_shapes=[
            pltpu.VMEM((2, B, C, GATHER_WINDOW), pixel_sampled_pc.dtype),
            pltpu.SemaphoreType.DMA((2, B)),
        ],
        compiler_params=pltpu.CompilerParams(
            vmem_limit_bytes=32 * 1024 * 1024),
    )(idx_slab, conf_slab, idx_slab, pixel_sampled_pc)

    left_pick = packed[:, :C]                      # (B, C)
    right_pick = packed[:, C:2 * C]                # (B, C)
    left_conf = packed[:, 2 * C:2 * C + 1]         # (B, 1)
    right_conf = packed[:, 2 * C + 1:2 * C + 2]    # (B, 1)
    return left_pick, right_pick, left_conf, right_conf


def _reference(left_hm, right_hm, pc):
    """Pure numpy reference mirroring the PyTorch get_action logic."""
    left_hm = np.asarray(left_hm)
    right_hm = np.asarray(right_hm)
    pc = np.asarray(pc)
    B = left_hm.shape[0]
    ar = np.arange(B)
    raw_l = pc[ar, :, left_hm.argmax(axis=1)]
    conf_l = left_hm.max(axis=1)
    raw_r = pc[ar, :, right_hm.argmax(axis=1)]
    conf_r = right_hm.max(axis=1)
    pick = np.stack((raw_l, raw_r))                       # (2, B, C)
    confidences = np.stack((conf_l, conf_r))              # (2, B)
    mask = np.logical_or(confidences >= THRESHOLD,
                         confidences.argmax(axis=0) == np.tile(np.arange(2), (B, 1)).T)
    pick[~mask] = -np.ones(pc.shape[1])
    return pick[0], pick[1], conf_l, conf_r


if __name__ == "__main__":
    B, C, N = 2, 2, 256   # 2 batch, 2-D pick coords (DUMMY_PICK is a 2-vector), 256 points

    key = jax.random.PRNGKey(0)
    k1, k2, k3 = jax.random.split(key, 3)
    left_hm = jax.random.normal(k1, (B, N), dtype=jnp.float32)
    right_hm = jax.random.normal(k2, (B, N), dtype=jnp.float32)
    pc = jax.random.normal(k3, (B, C, N), dtype=jnp.float32)

    # n_tile=128 -> 2 grid steps at N=256, exercising the running-argmax path.
    l_pick, r_pick, l_conf, r_conf = jax.block_until_ready(
        get_action_bimanual(left_hm, right_hm, pc, n_tile=128))

    # correctness check against numpy reference of the PyTorch logic
    ref_l, ref_r, ref_lc, ref_rc = _reference(left_hm, right_hm, pc)
    np.testing.assert_allclose(np.asarray(l_pick), ref_l, rtol=1e-6, atol=1e-6)
    np.testing.assert_allclose(np.asarray(r_pick), ref_r, rtol=1e-6, atol=1e-6)
    np.testing.assert_allclose(np.asarray(l_conf)[:, 0], ref_lc, rtol=1e-6, atol=1e-6)
    np.testing.assert_allclose(np.asarray(r_conf)[:, 0], ref_rc, rtol=1e-6, atol=1e-6)

    print("KERNEL_OK")
</pallas_src>

<mosaic_0001>
module attributes {stable_mosaic.version = 11 : i64} {
  func.func @_reduce_kernel(%arg0: i32, %arg1: memref<2x128xf32, #tpu.memory_space<vmem>>, %arg2: memref<2x128xf32, #tpu.memory_space<vmem>>, %arg3: memref<2x128xf32, #tpu.memory_space<vmem>>, %arg4: memref<2x128xi32, #tpu.memory_space<vmem>>, %arg5: memref<2x1xf32, #tpu.memory_space<vmem>>, %arg6: memref<2x1xf32, #tpu.memory_space<vmem>>, %arg7: memref<2x1xi32, #tpu.memory_space<vmem>>, %arg8: memref<2x1xi32, #tpu.memory_space<vmem>>) attributes {dimension_semantics = [#tpu.dimension_semantics<arbitrary>], iteration_bounds = array<i64: 2>, scalar_prefetch = 0 : i64, scratch_operands = 4 : i64, tpu.core_type = #tpu.core_type<tc>, window_params = [{transform_indices = @transform_0, window_bounds = array<i64: 2, 128>}, {transform_indices = @transform_1, window_bounds = array<i64: 2, 128>}, {pipeline_mode = #tpu.pipeline_mode<synchronous>, transform_indices = @transform_2, window_bounds = array<i64: 2, 128>}, {pipeline_mode = #tpu.pipeline_mode<synchronous>, transform_indices = @transform_3, window_bounds = array<i64: 2, 128>}]} {
    %c0_i32 = arith.constant 0 : i32
    %0 = arith.cmpi eq, %arg0, %c0_i32 : i32
    %1 = arith.extui %0 : i1 to i32
    %c0_i32_0 = arith.constant 0 : i32
    %2 = arith.cmpi ne, %1, %c0_i32_0 : i32
    scf.if %2 {
      %cst_31 = arith.constant 0xFF800000 : f32
      %47 = vector.broadcast %cst_31 : f32 to vector<2x1xf32>
      %c0_32 = arith.constant 0 : index
      %c0_33 = arith.constant 0 : index
      %48 = vector.load %arg5[%c0_32, %c0_33] : memref<2x1xf32, #tpu.memory_space<vmem>>, vector<2x1xf32>
      tpu.vector_store %arg5[%c0_32, %c0_33], %47 {strides = array<i32>} : memref<2x1xf32, #tpu.memory_space<vmem>>, vector<2x1xf32>,
      %cst_34 = arith.constant 0xFF800000 : f32
      %49 = vector.broadcast %cst_34 : f32 to vector<2x1xf32>
      %c0_35 = arith.constant 0 : index
      %c0_36 = arith.constant 0 : index
      %50 = vector.load %arg6[%c0_35, %c0_36] : memref<2x1xf32, #tpu.memory_space<vmem>>, vector<2x1xf32>
      tpu.vector_store %arg6[%c0_35, %c0_36], %49 {strides = array<i32>} : memref<2x1xf32, #tpu.memory_space<vmem>>, vector<2x1xf32>,
      %c0_i32_37 = arith.constant 0 : i32
      %51 = vector.broadcast %c0_i32_37 : i32 to vector<2x1xi32>
      %c0_38 = arith.constant 0 : index
      %c0_39 = arith.constant 0 : index
      %52 = vector.load %arg7[%c0_38, %c0_39] : memref<2x1xi32, #tpu.memory_space<vmem>>, vector<2x1xi32>
      tpu.vector_store %arg7[%c0_38, %c0_39], %51 {strides = array<i32>} : memref<2x1xi32, #tpu.memory_space<vmem>>, vector<2x1xi32>,
      %c0_i32_40 = arith.constant 0 : i32
      %53 = vector.broadcast %c0_i32_40 : i32 to vector<2x1xi32>
      %c0_41 = arith.constant 0 : index
      %c0_42 = arith.constant 0 : index
      %54 = vector.load %arg8[%c0_41, %c0_42] : memref<2x1xi32, #tpu.memory_space<vmem>>, vector<2x1xi32>
      tpu.vector_store %arg8[%c0_41, %c0_42], %53 {strides = array<i32>} : memref<2x1xi32, #tpu.memory_space<vmem>>, vector<2x1xi32>,
    } else {
    }
    %c0 = arith.constant 0 : index
    %c0_1 = arith.constant 0 : index
    %3 = vector.load %arg1[%c0, %c0_1] : memref<2x128xf32, #tpu.memory_space<vmem>>, vector<2x128xf32>
    %c0_2 = arith.constant 0 : index
    %c0_3 = arith.constant 0 : index
    %4 = vector.load %arg2[%c0_2, %c0_3] : memref<2x128xf32, #tpu.memory_space<vmem>>, vector<2x128xf32>
    %5 = tpu.iota {dimensions = array<i32: 1>} : vector<2x128xi32>
    %cst = arith.constant dense<0xFF800000> : vector<2xf32>
    %6 = vector.multi_reduction <maximumf>, %3, %cst [1] : vector<2x128xf32> to vector<2xf32>
    %7 = vector.shape_cast %6 : vector<2xf32> to vector<2x1xf32>
    %cst_4 = arith.constant dense<0xFF800000> : vector<2xf32>
    %8 = vector.multi_reduction <maximumf>, %4, %cst_4 [1] : vector<2x128xf32> to vector<2xf32>
    %9 = vector.shape_cast %8 : vector<2xf32> to vector<2x1xf32>
    %10 = vector.broadcast %7 : vector<2x1xf32> to vector<2x128xf32>
    %11 = arith.cmpf oeq, %3, %10 : vector<2x128xf32>
    %c128_i32 = arith.constant 128 : i32
    %12 = vector.broadcast %c128_i32 : i32 to vector<2x128xi32>
    %13 = arith.select %11, %5, %12 : vector<2x128xi1>, vector<2x128xi32>
    %cst_5 = arith.constant dense<2147483647> : vector<2xi32>
    %14 = vector.multi_reduction <minsi>, %13, %cst_5 [1] : vector<2x128xi32> to vector<2xi32>
    %15 = vector.shape_cast %14 : vector<2xi32> to vector<2x1xi32>
    %16 = vector.broadcast %9 : vector<2x1xf32> to vector<2x128xf32>
    %17 = arith.cmpf oeq, %4, %16 : vector<2x128xf32>
    %c128_i32_6 = arith.constant 128 : i32
    %18 = vector.broadcast %c128_i32_6 : i32 to vector<2x128xi32>
    %19 = arith.select %17, %5, %18 : vector<2x128xi1>, vector<2x128xi32>
    %cst_7 = arith.constant dense<2147483647> : vector<2xi32>
    %20 = vector.multi_reduction <minsi>, %19, %cst_7 [1] : vector<2x128xi32> to vector<2xi32>
    %21 = vector.shape_cast %20 : vector<2xi32> to vector<2x1xi32>
    %c0_8 = arith.constant 0 : index
    %c0_9 = arith.constant 0 : index
    %22 = vector.load %arg5[%c0_8, %c0_9] : memref<2x1xf32, #tpu.memory_space<vmem>>, vector<2x1xf32>
    %23 = arith.cmpf ogt, %7, %22 : vector<2x1xf32>
    %c0_10 = arith.constant 0 : index
    %c0_11 = arith.constant 0 : index
    %24 = vector.load %arg6[%c0_10, %c0_11] : memref<2x1xf32, #tpu.memory_space<vmem>>, vector<2x1xf32>
    %25 = arith.cmpf ogt, %9, %24 : vector<2x1xf32>
    %c0_12 = arith.constant 0 : index
    %c0_13 = arith.constant 0 : index
    %26 = vector.load %arg5[%c0_12, %c0_13] : memref<2x1xf32, #tpu.memory_space<vmem>>, vector<2x1xf32>
    %27 = arith.select %23, %7, %26 : vector<2x1xi1>, vector<2x1xf32>
    %c0_14 = arith.constant 0 : index
    %c0_15 = arith.constant 0 : index
    %28 = vector.load %arg5[%c0_14, %c0_15] : memref<2x1xf32, #tpu.memory_space<vmem>>, vector<2x1xf32>
    tpu.vector_store %arg5[%c0_14, %c0_15], %27 {strides = array<i32>} : memref<2x1xf32, #tpu.memory_space<vmem>>, vector<2x1xf32>,
    %c0_16 = arith.constant 0 : index
    %c0_17 = arith.constant 0 : index
    %29 = vector.load %arg6[%c0_16, %c0_17] : memref<2x1xf32, #tpu.memory_space<vmem>>, vector<2x1xf32>
    %30 = arith.select %25, %9, %29 : vector<2x1xi1>, vector<2x1xf32>
    %c0_18 = arith.constant 0 : index
    %c0_19 = arith.constant 0 : index
    %31 = vector.load %arg6[%c0_18, %c0_19] : memref<2x1xf32, #tpu.memory_space<vmem>>, vector<2x1xf32>
    tpu.vector_store %arg6[%c0_18, %c0_19], %30 {strides = array<i32>} : memref<2x1xf32, #tpu.memory_space<vmem>>, vector<2x1xf32>,
    %c128_i32_20 = arith.constant 128 : i32
    %32 = arith.muli %arg0, %c128_i32_20 : i32
    %33 = vector.broadcast %32 : i32 to vector<2x1xi32>
    %34 = arith.addi %33, %15 : vector<2x1xi32>
    %c0_21 = arith.constant 0 : index
    %c0_22 = arith.constant 0 : index
    %35 = vector.load %arg7[%c0_21, %c0_22] : memref<2x1xi32, #tpu.memory_space<vmem>>, vector<2x1xi32>
    %36 = arith.select %23, %34, %35 : vector<2x1xi1>, vector<2x1xi32>
    %c0_23 = arith.constant 0 : index
    %c0_24 = arith.constant 0 : index
    %37 = vector.load %arg7[%c0_23, %c0_24] : memref<2x1xi32, #tpu.memory_space<vmem>>, vector<2x1xi32>
    tpu.vector_store %arg7[%c0_23, %c0_24], %36 {strides = array<i32>} : memref<2x1xi32, #tpu.memory_space<vmem>>, vector<2x1xi32>,
    %c128_i32_25 = arith.constant 128 : i32
    %38 = arith.muli %arg0, %c128_i32_25 : i32
    %39 = vector.broadcast %38 : i32 to vector<2x1xi32>
    %40 = arith.addi %39, %21 : vector<2x1xi32>
    %c0_26 = arith.constant 0 : index
    %c0_27 = arith.constant 0 : index
    %41 = vector.load %arg8[%c0_26, %c0_27] : memref<2x1xi32, #tpu.memory_space<vmem>>, vector<2x1xi32>
    %42 = arith.select %25, %40, %41 : vector<2x1xi1>, vector<2x1xi32>
    %c0_28 = arith.constant 0 : index
    %c0_29 = arith.constant 0 : index
    %43 = vector.load %arg8[%c0_28, %c0_29] : memref<2x1xi32, #tpu.memory_space<vmem>>, vector<2x1xi32>
    tpu.vector_store %arg8[%c0_28, %c0_29], %42 {strides = array<i32>} : memref<2x1xi32, #tpu.memory_space<vmem>>, vector<2x1xi32>,
    %c1_i32 = arith.constant 1 : i32
    %44 = arith.cmpi eq, %arg0, %c1_i32 : i32
    %45 = arith.extui %44 : i1 to i32
    %c0_i32_30 = arith.constant 0 : i32
    %46 = arith.cmpi ne, %45, %c0_i32_30 : i32
    scf.if %46 {
      %cst_31 = arith.constant 0.000000e+00 : f32
      %47 = vector.broadcast %cst_31 : f32 to vector<2x126xf32>
      %c0_i32_32 = arith.constant 0 : i32
      %48 = vector.broadcast %c0_i32_32 : i32 to vector<2x126xi32>
      %c0_33 = arith.constant 0 : index
      %c0_34 = arith.constant 0 : index
      %49 = vector.load %arg5[%c0_33, %c0_34] : memref<2x1xf32, #tpu.memory_space<vmem>>, vector<2x1xf32>
      %c0_35 = arith.constant 0 : index
      %c0_36 = arith.constant 0 : index
      %50 = vector.load %arg6[%c0_35, %c0_36] : memref<2x1xf32, #tpu.memory_space<vmem>>, vector<2x1xf32>
      %51 = tpu.concatenate %49, %50, %47 in 1 : vector<2x1xf32>, vector<2x1xf32>, vector<2x126xf32> -> vector<2x128xf32>
      %c0_37 = arith.constant 0 : index
      %c0_38 = arith.constant 0 : index
      %52 = vector.load %arg3[%c0_37, %c0_38] : memref<2x128xf32, #tpu.memory_space<vmem>>, vector<2x128xf32>
      tpu.vector_store %arg3[%c0_37, %c0_38], %51 {strides = array<i32>} : memref<2x128xf32, #tpu.memory_space<vmem>>, vector<2x128xf32>,
      %c0_39 = arith.constant 0 : index
      %c0_40 = arith.constant 0 : index
      %53 = vector.load %arg7[%c0_39, %c0_40] : memref<2x1xi32, #tpu.memory_space<vmem>>, vector<2x1xi32>
      %c0_41 = arith.constant 0 : index
      %c0_42 = arith.constant 0 : index
      %54 = vector.load %arg8[%c0_41, %c0_42] : memref<2x1xi32, #tpu.memory_space<vmem>>, vector<2x1xi32>
      %55 = tpu.concatenate %53, %54, %48 in 1 : vector<2x1xi32>, vector<2x1xi32>, vector<2x126xi32> -> vector<2x128xi32>
      %c0_43 = arith.constant 0 : index
      %c0_44 = arith.constant 0 : index
      %56 = vector.load %arg4[%c0_43, %c0_44] : memref<2x128xi32, #tpu.memory_space<vmem>>, vector<2x128xi32>
      tpu.vector_store %arg4[%c0_43, %c0_44], %55 {strides = array<i32>} : memref<2x128xi32, #tpu.memory_space<vmem>>, vector<2x128xi32>,
    } else {
    }
    return
  }
  func.func @transform_0(%arg0: i32) -> (i32, i32) {
    %c0_i32 = arith.constant 0 : i32
    %c0_i32_0 = arith.constant 0 : i32
    return %c0_i32, %arg0 : i32, i32
  }
  func.func @transform_1(%arg0: i32) -> (i32, i32) {
    %c0_i32 = arith.constant 0 : i32
    %c0_i32_0 = arith.constant 0 : i32
    return %c0_i32, %arg0 : i32, i32
  }
  func.func @transform_2(%arg0: i32) -> (i32, i32) {
    %c0_i32 = arith.constant 0 : i32
    %c0_i32_0 = arith.constant 0 : i32
    %c0_i32_1 = arith.constant 0 : i32
    return %c0_i32, %c0_i32_0 : i32, i32
  }
  func.func @transform_3(%arg0: i32) -> (i32, i32) {
    %c0_i32 = arith.constant 0 : i32
    %c0_i32_0 = arith.constant 0 : i32
    %c0_i32_1 = arith.constant 0 : i32
    return %c0_i32, %c0_i32_0 : i32, i32
  }
}

</mosaic_0001>

<bundles_post_ra>
// kernel: tpu_custom_call.1
= control target key start
LH: loop header
LB: loop body
LE: loop exit
PB: predicated region body
PF: predicated region fallthrough
CT: control target
= control target key end

     0   :  { %9 = vsyncpa [#allocation7], 0  ;;  %s840_s0 = inlined_call_operand.hbm [shape: f32[2,256], index: 0, kind: input, shape index: {}]   ;;  %s841_s1 = inlined_call_operand.hbm [shape: f32[2,256], index: 1, kind: input, shape index: {}]   ;;  %s842_s2 = inlined_call_operand.hbm [shape: f32[2,128], index: 2, kind: output, shape index: {0}]   ;;  %s843_s3 = inlined_call_operand.hbm [shape: s32[2,128], index: 3, kind: output, shape index: {1}]  }
   0x1   :  { %11 = vsyncpa [#allocation7 + $0x1], 0 }
   0x2   :  { %12 = vsyncpa [#allocation10], 0 }
   0x3   :  { %14 = vsyncpa [#allocation10 + $0x1], 0 }
   0x4   :  { %15 = vsyncpa [#allocation8], 0 }
   0x5   :  { %16 = vsyncpa [#allocation13], 0  ;;  %s685_s12 = smov 0   ;;  %s687_s13 = smov 0  }
   0x6   :  { %s689_s14 = smov 0   ;;  %s691_s15 = smov 0  }
   0x7 LB: > { %s704_s16 = sadd.s32 4294967295, %s658_s15   ;;  %s707_s17 = sadd.s32 1, %s658_s15   ;;  %s658_s15 = sphi %s691_s15, %s851_s15   ;;  %s654_s14 = sphi %s689_s14, %s850_s14   ;;  %s650_s13 = sphi %s687_s13, %s849_s13   ;;  %s646_s12 = sphi %s685_s12, %s848_s12  }
   0x8   : > { %s26_s18 = ssub.s32 %s658_s15, %s707_s17  ;;  %s29_s19 = sadd.s32 1, %s654_s14 }
   0x9   : > { %p27_p0 = scmp.eq.s32.totalorder %s26_s18, 0  ;;  %p36_p1 = scmp.ne.s32.totalorder %s654_s14, %s650_s13 }
   0xa   : > { %p37_p2 = scmp.eq.s32.totalorder %s658_s15, 0  ;;  %p42_p3 = scmp.ne.s32.totalorder %s650_s13, %s646_s12 }
   0xb   : > { %s717_s20 = scalar_select %p27_p0, %s654_s14, %s29_s19  }
   0xc   : > { %p719_p4 = por %p37_p2, %p36_p1  ;;  %p43_p5 = scmp.eq.s32.totalorder %s704_s16, 0 }
   0xd   : > { %p454_p6 = scmp.lt.s32.totalorder %s658_s15, 2  ;;  %s730_s23 = sand.u32 1, %s654_s14  }
   0xe   : > { %p725_p7 = por %p43_p5, %p42_p3  ;;  %s419_s24 = sshll.u32 %s730_s23, 1 }
   0xf   : > { %s420_s25 = sshll.u32 %s658_s15, 1  ;;  %s138_s29 = scalar_lea.vmem [#allocation6], %s419_s24 }
  0x10   : > { %s142_s28 = scalar_lea.hbm %s840_s0, %s420_s25  ;;  %s146_s30 = sshll.u32 %s138_s29, 4  ;;  %s147_s30 = int_to_ptr.vmem [resolvable:$true] %s146_s30 }
  0x11   : > { %s144_s4 = sshll.u32 %s142_s28, 4  ;;  %p739_p8 = pnand %p454_p6, %p719_p4  ;;  %s145_s4 = int_to_ptr.hbm [resolvable:$true] %s144_s4 }
  0x12   : > { %p423_p9 = scmp.ge.s32.totalorder %s658_s15, 1  ;;  %p170_p10 = scmp.lt.s32.totalorder %s658_s15, 3 }
  0x13   : > { %s135_s6 = scalar_lea.sflag [#allocation7], %s730_s23  ;;  %s496_s7 = sshra.s32 %s145_s4, 4  ;;  %s497_s7 = int_to_ptr.hbm [resolvable:$true] %s496_s7 }
  0x14   : > { %s498_s8 = scalar_lea.hbm %s497_s7, 2  ;;  %p500_p12 = pneg %p739_p8 }
  0x15   : > { %p499_p11 = scmp.ne.s32.totalorder %s497_s7, %s498_s8  ;;  %s503_s11 = scalar_lea.hbm %s840_s0, 4 }
  0x16   : > { %p504_p1 = scmp.lt.s32.totalorder %s497_s7, %s840_s0  ;;  %p505_p2 = scmp.lt.s32.totalorder %s503_s11, %s498_s8 }
  0x17   : > { %p501_p13 = pnand %p500_p12, %p499_p11 }
  0x18   : > { %p506_p3 = por %p505_p2, %p504_p1 }
  0x19   : > { %p502_p0 = pneg %p501_p13 }
  0x1b   : > { %p507_p4 = pnand %p506_p3, %p502_p0 }
  0x1d   : > { %510 = shalt.err (!%p507_p4)
}
  0x1e   : > { %450 = dma.hbm_to_vmem [thread:$0]  (!%p739_p8), %s145_s4, 32, %s147_s30, %s135_s6  }
  0x1f   : > { %p763_p5 = pnand %p423_p9, %p170_p10  ;;  %s161_s27 = scalar_lea.hbm %s841_s1, %s420_s25 }
  0x20   : > { %s157_s28 = scalar_lea.vmem [#allocation9], %s419_s24  ;;  %s163_s7 = sshll.u32 %s161_s27, 4  ;;  %s164_s7 = int_to_ptr.hbm [resolvable:$true] %s163_s7 }
  0x21   : > { %s165_s29 = sshll.u32 %s157_s28, 4  ;;  %s154_s8 = scalar_lea.sflag [#allocation10], %s730_s23  ;;  %s166_s29 = int_to_ptr.vmem [resolvable:$true] %s165_s29 }
  0x22   : > { %s526_s9 = sshra.s32 %s164_s7, 4  ;;  %s533_s4 = scalar_lea.hbm %s841_s1, 4  ;;  %s527_s9 = int_to_ptr.hbm [resolvable:$true] %s526_s9 }
  0x23   : > { %s528_s10 = scalar_lea.hbm %s527_s9, 2  ;;  %p534_p11 = scmp.lt.s32.totalorder %s527_s9, %s841_s1 }
  0x24   : > { %p529_p6 = scmp.ne.s32.totalorder %s527_s9, %s528_s10  ;;  %p535_p13 = scmp.lt.s32.totalorder %s533_s4, %s528_s10 }
  0x26   : > { %p531_p9 = pnand %p529_p6, %p500_p12  ;;  %p536_p0 = por %p535_p13, %p534_p11 }
  0x28   : > { %p532_p10 = pneg %p531_p9 }
  0x2a   : > { %p537_p1 = pnand %p536_p0, %p532_p10 }
  0x2c   : > { %540 = shalt.err (!%p537_p1)
}
  0x2d   : > { %453 = dma.hbm_to_vmem [thread:$0]  (!%p739_p8), %s164_s7, 32, %s166_s29, %s154_s8  }
  0x2e   : > { %174 = sbr.rel (%p763_p5) target bundleno = 578 (0x242), region = 28  ;;  %s176_s23 = sand.u32 (!%p763_p5), 1, %s650_s13  }
  0x2f   : > { %s424_s24 = sshll.u32 (!%p763_p5), %s176_s23, 1  ;;  %s177_s11 = scalar_lea.sflag (!%p763_p5), [#allocation7], %s176_s23 }
  0x30   : > { %s180_s12 = scalar_lea.vmem (!%p763_p5), [#allocation6], %s424_s24 }
  0x33   : > { %629 = dma.done.wait (%p725_p7), %s177_s11, 32  }
  0x34   : > { %631 = vsyncadd (%p725_p7), %s177_s11, 4294967264  ;;  %s187_s18 = scalar_lea.sflag [#allocation10], %s176_s23  ;;  %s190_s21 = scalar_lea.vmem [#allocation9], %s424_s24 }
  0x35   : > { %633 = dma.done.wait (%p725_p7), %s187_s18, 32  }
  0x36   : > { %635 = vsyncadd (%p725_p7), %s187_s18, 4294967264  ;;  %p426_p8 = scmp.ne.s32.totalorder %s704_s16, 0 }
  0x38   : > { %217 = sbr.rel (%p426_p8) target bundleno = 66 (0x42), region = 40 }
  0x3d   : > { %vm218_vm0 = vcmask 1024   ;;  %v660_v0 = vmov -inf   ;;  %v661_v1 = vmov 0  }
  0x3e   : > { %219 = vst.msk [vmem:[#allocation2] sm:$0x3] %vm218_vm0, %v660_v0 }
  0x3f   : > { %220 = vst.msk [vmem:[#allocation3] sm:$0x3] %vm218_vm0, %v660_v0 }
  0x40   : > { %221 = vst.msk [vmem:[#allocation4] sm:$0x3] %vm218_vm0, %v661_v1 }
  0x41   : > { %222 = vst.msk [vmem:[#allocation5] sm:$0x3] %vm218_vm0, %v661_v1 }
  0x42 PF: > { %v223_v2 = vld [vmem:[%s180_s12] sm:$0x3]  ;;  %vm227_vm1 = vcmask 1041408   ;;  %v224_v4 = vld [vmem:[%s190_s21] sm:$0x3]  ;;  %v225_v6 = vlaneseq  ;;  %vm273_vm2 = vcmask 1024  }
  0x43   : > { %v228_v3 = vsel %vm227_vm1, %v223_v2, -inf  ;;  %v231_v5 = vsel %vm227_vm1, %v224_v4, -inf  ;;  %s427_s22 = sshll.u32 %s704_s16, 7  ;;  %p428_p7 = scmp.ne.s32.totalorder %s704_s16, 1 }
  0x44   : > { %229 = vmax.xlane.f32.xlu0 %v228_v3  ;;  %v226_v8 = vand.u32 127, %v225_v6  ;;  %v279_v35 = vstv %s427_s22  ;;  %s662_s5 = smov (!%p428_p7), 1  }
  0x45   : > { %v268_v7 = vld [vmem:[#allocation2] sm:$0x3] }
  0x46   : > { %v270_v15 = vld [vmem:[#allocation3] sm:$0x3] }
  0x47   : > { %v275_v16 = vld [vmem:[#allocation3] sm:$0x3]  ;;  %v281_v37 = vld [vmem:[#allocation4] sm:$0x3] }
  0x48   : > { %v285_v45 = vld [vmem:[#allocation5] sm:$0x3] }
  0x4c   : > { %232 = vmax.xlane.f32.xlu0 %v231_v5 }
  0xb7   : > { %v230_v9 = vpop.xlane.xlu0 %229 }
  0xb8   : > { %vm234_vm3 = vcmp.eq.f32.partialorder %v223_v2, %v230_v9  ;;  %vm269_vm4 = vcmp.gt.f32.partialorder %v230_v9, %v268_v7 }
  0xb9   : > { %v272_v10 = vsel %vm269_vm4, %v230_v9, %v268_v7  ;;  %v235_v11 = vsel %vm234_vm3, %v226_v8, 128 }
  0xba   : > { %274 = vst.msk [vmem:[#allocation2] sm:$0x3] %vm273_vm2, %v272_v10  ;;  %v236_v12 = vsel %vm227_vm1, %v235_v11, 2147483647 }
  0xbb   : > { %v238_v13 = vshra.s32 %v236_v12, 16  ;;  %v237_v23 = vand.u32 65535, %v236_v12 }
  0xbd   : > { %v240_v14 = vcvt.s32.f32 %v238_v13  ;;  %v239_v25 = vcvt.s32.f32 %v237_v23 }
  0xbf   : > { %241 = vmin.xlane.f32.xlu1 %v240_v14  ;;  %v233_v17 = vpop.xlane.xlu0 %232 }
  0xc0   : > { %vm251_vm5 = vcmp.eq.f32.partialorder %v224_v4, %v233_v17  ;;  %vm271_vm6 = vcmp.gt.f32.partialorder %v233_v17, %v270_v15 }
  0xc1   : > { %v252_v18 = vsel %vm251_vm5, %v226_v8, 128  ;;  %v276_v19 = vsel %vm271_vm6, %v233_v17, %v275_v16 }
  0xc2   : > { %277 = vst.msk [vmem:[#allocation3] sm:$0x3] %vm273_vm2, %v276_v19  ;;  %v253_v20 = vsel %vm227_vm1, %v252_v18, 2147483647 }
  0xc3   : > { %v255_v21 = vshra.s32 %v253_v20, 16  ;;  %v254_v27 = vand.u32 65535, %v253_v20 }
  0xc5   : > { %v257_v22 = vcvt.s32.f32 %v255_v21  ;;  %v256_v29 = vcvt.s32.f32 %v254_v27 }
  0xc7   : > { %258 = vmin.xlane.f32.xlu1 %v257_v22 }
 0x132   : > { %v242_v24 = vpop.xlane.xlu1 %241 }
 0x133   : > { %vm243_vm7 = vcmp.eq.f32.partialorder %v240_v14, %v242_v24  ;;  %v248_v31 = vcvt.f32.s32 %v242_v24 }
 0x134   : > { %v244_v26 = vsel %vm243_vm7, %v239_v25, inf }
 0x135   : > { %245 = vmin.xlane.f32.xlu2 %v244_v26  ;;  %v249_v33 = vshll.u32 %v248_v31, 16 }
 0x13a   : > { %v259_v28 = vpop.xlane.xlu1 %258 }
 0x13b   : > { %vm260_vm8 = vcmp.eq.f32.partialorder %v257_v22, %v259_v28  ;;  %v265_v38 = vcvt.f32.s32 %v259_v28 }
 0x13c   : > { %v261_v30 = vsel %vm260_vm8, %v256_v29, inf }
 0x13d   : > { %262 = vmin.xlane.f32.xlu2 %v261_v30  ;;  %v266_v42 = vshll.u32 %v265_v38, 16 }
 0x1a8   : > { %v246_v32 = vpop.xlane.xlu2 %245 }
 0x1a9   : > { %v247_v34 = vcvt.f32.s32 %v246_v32 }
 0x1ab   : > { %v250_v36 = vadd.s32 %v249_v33, %v247_v34 }
 0x1ad   : > { %v280_v39 = vadd.s32 %v279_v35, %v250_v36 }
 0x1af   : > { %v282_v40 = vsel %vm269_vm4, %v280_v39, %v281_v37 }
 0x1b0   : > { %283 = vst.msk [vmem:[#allocation4] sm:$0x3] %vm273_vm2, %v282_v40  ;;  %v263_v41 = vpop.xlane.xlu2 %262 }
 0x1b1   : > { %v264_v43 = vcvt.f32.s32 %v263_v41 }
 0x1b3   : > { %v267_v44 = vadd.s32 %v266_v42, %v264_v43 }
 0x1b4   : > { %291 = sbr.rel (%p428_p7) target bundleno = 568 (0x238), region = 44 }
 0x1b5   : > { %v284_v46 = vadd.s32 %v279_v35, %v267_v44 }
 0x1b7   : > { %v286_v47 = vsel %vm271_vm6, %v284_v46, %v285_v45 }
 0x1b8   : > { %287 = vst.msk [vmem:[#allocation5] sm:$0x3] %vm273_vm2, %v286_v47 }
 0x1b9   : > { %v293_v48 = vld [vmem:[#allocation3] sm:$0x3]  ;;  %vm298_vm9 = vcmask 7168   ;;  %v292_v50 = vld [vmem:[#allocation2] sm:$0x3]  ;;  %vm300_vm10 = vcmask 15360  }
 0x1ba   : > { %295 = vrot.lane.b32.xlu0 %v293_v48, %s662_s5  ;;  %v303_v54 = vld [vmem:[#allocation4] sm:$0x3] }
 0x1bf   : > { %v304_v49 = vld [vmem:[#allocation5] sm:$0x3] }
 0x1c2   : > { %305 = vrot.lane.b32.xlu0 %v304_v49, %s662_s5 }
 0x22c   : > { %v296_v51 = vpop.permute.xlu0 %295 }
 0x22d   : > { %v299_v52 = vsel %vm298_vm9, %v292_v50, %v296_v51 }
 0x22e   : > { %v301_v53 = vsel %vm300_vm10, %v299_v52, 0.0 }
 0x22f   : > { %302 = vst [vmem:[#allocation11] sm:$0x3] %v301_v53 }
 0x234   : > { %v306_v55 = vpop.permute.xlu0 %305 }
 0x235   : > { %v307_v56 = vsel %vm298_vm9, %v303_v54, %v306_v55 }
 0x236   : > { %v308_v57 = vsel %vm300_vm10, %v307_v56, 0 }
 0x237   : > { %309 = vst [vmem:[#allocation12] sm:$0x3] %v308_v57 }
 0x238 PF: > { %p455_p12 = scmp.eq.s32.totalorder %s704_s16, 1  ;;  %s663_s19 = smov [#allocation11]  }
 0x239   : > { %s316_s26 = sshll.u32 %s663_s19, 4  ;;  %s318_s29 = sshll.u32 %s842_s2, 4  ;;  %s317_s26 = int_to_ptr.vmem [resolvable:$true] %s316_s26  ;;  %s319_s29 = int_to_ptr.hbm [resolvable:$true] %s318_s29 }
 0x23a   : > { %440 = dma.vmem_to_hbm [thread:$0]  (%p455_p12), %s317_s26, 32, %s319_s29, [#allocation8]  }
 0x23b   : > { %s330_s9 = sshll.u32 %s843_s3, 4  ;;  %s664_s10 = smov [#allocation12]   ;;  %s331_s9 = int_to_ptr.hbm [resolvable:$true] %s330_s9 }
 0x23c   : > { %s328_s15 = sshll.u32 %s664_s10, 4  ;;  %s329_s15 = int_to_ptr.vmem [resolvable:$true] %s328_s15 }
 0x23d   : > { %442 = dma.vmem_to_hbm [thread:$0]  (%p455_p12), %s329_s15, 32, %s331_s9, [#allocation13]  }
 0x23e   : > { %637 = dma.done.wait (%p455_p12), [#allocation8], 32  }
 0x23f   : > { %639 = vsyncadd (%p455_p12), [#allocation8], 4294967264 }
 0x240   : > { %641 = dma.done.wait (%p455_p12), [#allocation13], 32  }
 0x241   : > { %643 = vsyncadd (%p455_p12), [#allocation13], 4294967264 }
 0x242 PF: > { %p19_p2 = scmp.ge.s32.totalorder %s707_s17, 4   ;;  %s848_s12 = smov %s650_s13 }
 0x243   : > { %s849_s13 = smov %s654_s14  ;;  %s850_s14 = smov %s717_s20 }
 0x244   : > { %s851_s15 = smov %s707_s17  ;;  %21 = sbr.rel (!%p19_p2) target bundleno = 7 (0x7), region = 94 }
 0x249   :  { %349 = vsyncpa [#allocation7], 1 }
 0x24a   :  { %351 = vsyncpa [#allocation7 + $0x1], 1 }
 0x24b   :  { %352 = vsyncpa [#allocation10], 1 }
 0x24c   :  { %354 = vsyncpa [#allocation10 + $0x1], 1 }
 0x24d   :  { %355 = vsyncpa [#allocation8], 1 }
 0x24e   :  { %357 = vsyncpa [#allocation8 + $0x1], 1 }
 0x24f   :  { %358 = vsyncpa [#allocation13], 1 }

</bundles_post_ra>
